<compile_context>
chip_gen: v5e
topology: v5e:2x2
jax: 0.10.0
libtpu: 0.0.40
codegen_flags: <defaults>
</compile_context>

<pallas_src>
import functools

import jax
import jax.numpy as jnp
from jax.experimental import pallas as pl
from jax.experimental.pallas import tpu as pltpu


def _round_up(x, m):
    return ((x + m - 1) // m) * m


def _auto_block_b(B):
    """Batch tile: ~256 rows per step, even #steps >= 2 (v7x two-TC split)."""
    steps = max(2, pl.cdiv(B, 256))
    steps += steps % 2
    return _round_up(pl.cdiv(B, steps), 8)


def _vmem_limit_bytes(x, prepared, block_b, out_pad_last):
    """Generous scoped-VMEM budget: double-buffered weights + act/io tiles."""
    bpe = lambda a: a.size * a.dtype.itemsize
    wb = 2 * sum(bpe(w) + bpe(b) for w, b in prepared)     # pipeline buffers x2
    widths = [x.shape[1]] + [b.shape[1] for _, b in prepared]
    act = 8 * block_b * max(widths) * 4                    # f32 intermediates
    io = 2 * 4 * block_b * (x.shape[1] + out_pad_last)     # in/out tiles x2
    est = wb + act + io + (4 << 20)
    return int(min(max(est, 32 << 20), 64 << 20))


def _fcnet_fused_kernel(x_ref, *refs, activations):
    """All FCNet layers fused.  refs = (w0, b0, w1, b1, ..., o_ref).

    Weights are already weight_norm-scaled, transposed to (in, out),
    zero-padded to lane-dense widths and stored in the MXU operand dtype
    (bf16 by default) in the wrapper.  Biases/activations stay f32.
    """
    o_ref = refs[-1]
    wb = refs[:-1]
    h = x_ref[...].astype(jnp.float32)                     # (tb, in_dim)
    for i, act in enumerate(activations):
        w = wb[2 * i][...]                                 # (in_pad, out_pad)
        b = wb[2 * i + 1][...]                             # (1, out_pad) f32
        lhs = h if h.dtype == w.dtype else h.astype(w.dtype)
        y = jnp.dot(lhs, w, preferred_element_type=jnp.float32) + b
        if act == "tanh":
            h = jnp.tanh(y)
        else:
            # sigmoid via tanh: keeps the transcendental on the EUP slot,
            # avoids an exact VPU divide.  Mathematically identical.
            h = 0.5 * (1.0 + jnp.tanh(0.5 * y))
    o_ref[...] = h.astype(o_ref.dtype)


def fcnet_forward(x, prepared, activations, *, block_b=None):
    """Single fused pallas_call over the whole FCNet stack (grid over batch)."""
    B, in_dim = x.shape
    out_pad_last = prepared[-1][1].shape[1]
    if block_b is None:
        block_b = _auto_block_b(B)
    block_b = min(block_b, _round_up(B, 8))

    in_specs = [pl.BlockSpec((block_b, in_dim), lambda i: (i, 0))]
    flat_params = []
    for w, b in prepared:
        # Full weight / bias VMEM-resident; constant block index -> DMA'd once,
        # not re-issued per batch tile.
        in_specs.append(pl.BlockSpec(w.shape, lambda i: (0, 0)))
        in_specs.append(pl.BlockSpec(b.shape, lambda i: (0, 0)))
        flat_params += [w, b]

    kernel = functools.partial(_fcnet_fused_kernel,
                               activations=tuple(activations))
    return pl.pallas_call(
        kernel,
        out_shape=jax.ShapeDtypeStruct((B, out_pad_last), jnp.float32),
        grid=(pl.cdiv(B, block_b),),
        in_specs=in_specs,
        out_specs=pl.BlockSpec((block_b, out_pad_last), lambda i: (i, 0)),
        compiler_params=pltpu.CompilerParams(
            dimension_semantics=("parallel",),
            vmem_limit_bytes=_vmem_limit_bytes(x, prepared, block_b,
                                               out_pad_last)),
    )(x, *flat_params)


class FCNetPallas:
    """Pallas port of FCNet(dims, dropout) — inference forward pass."""

    def __init__(self, dims, key):
        self.dims = list(dims)
        self.out_dim = dims[-1]
        self.activations = ["tanh"] * (len(dims) - 2) + ["sigmoid"]

        # Raw PyTorch-style parameters (weight_norm(dim=None) parametrization).
        self.params = []
        for i in range(len(dims) - 1):
            in_dim, out_dim = dims[i], dims[i + 1]
            key, kw, kb = jax.random.split(key, 3)
            bound = 1.0 / (in_dim ** 0.5)
            v = jax.random.uniform(kw, (out_dim, in_dim), jnp.float32,
                                   minval=-bound, maxval=bound)
            b = jax.random.uniform(kb, (out_dim,), jnp.float32,
                                   minval=-bound, maxval=bound)
            g = jnp.sqrt(jnp.sum(v * v))   # weight_norm(dim=None) init: ||v||_F
            self.params.append((v, g, b))
        self._prep_cache = {}

    def _prepared(self, mm_dtype):
        """Fold weight_norm scale, transpose to (in,out), zero-pad feature dims
        to multiples of 128 (lane-dense stores) and cast to the MXU dtype ONCE."""
        mm_dtype = jnp.dtype(mm_dtype)
        if mm_dtype in self._prep_cache:
            return self._prep_cache[mm_dtype]
        prepared = []
        in_pad = self.dims[0]               # input activations left unpadded
        for (v, g, b) in self.params:
            out_dim, in_dim = v.shape
            out_pad = _round_up(out_dim, 128)
            scale = g / jnp.sqrt(jnp.sum(v * v))        # weight_norm, dim=None
            w_t = (v * scale).T                         # (in_dim, out_dim)
            w_pad = jnp.zeros((in_pad, out_pad), jnp.float32)
            w_pad = w_pad.at[:in_dim, :out_dim].set(w_t)
            b_pad = jnp.zeros((1, out_pad), jnp.float32)
            b_pad = b_pad.at[0, :out_dim].set(b)
            prepared.append((w_pad.astype(mm_dtype), b_pad))   # bias stays f32
            in_pad = out_pad
        self._prep_cache[mm_dtype] = prepared
        return prepared

    def __call__(self, x, *, use_bf16_matmul=True, block_b=None):
        mm_dtype = jnp.bfloat16 if use_bf16_matmul else jnp.float32
        out = fcnet_forward(x, self._prepared(mm_dtype), self.activations,
                            block_b=block_b)
        return out[:, :self.out_dim]        # drop lane padding

    def reference(self, x, *, matmul_dtype=jnp.float32):
        h = x
        n = len(self.params)
        for i, (v, g, b) in enumerate(self.params):
            w = v * (g / jnp.sqrt(jnp.sum(v * v)))
            y = jnp.dot(h.astype(matmul_dtype), w.T.astype(matmul_dtype),
                        preferred_element_type=jnp.float32) + b
            h = jax.nn.sigmoid(y) if i == n - 1 else jnp.tanh(y)
        return h


if __name__ == "__main__":
    key = jax.random.PRNGKey(0)
    k_param, k_x = jax.random.split(key)

    dims = [32, 64, 16]      # FCNet([32, 64, 16]): wn-Linear+Tanh, wn-Linear+Sigmoid
    batch = 256              # -> block_b=128, 2 "parallel" grid steps (both v7x TCs)

    net = FCNetPallas(dims, k_param)
    x = jax.random.normal(k_x, (batch, dims[0]), jnp.float32)

    ref_f32 = net.reference(x)
    ref_bf16 = net.reference(x, matmul_dtype=jnp.bfloat16)

    # Default path: bf16 MXU operands (fast on v5e/v6e/v7x), f32 accumulation,
    # f32 bias + activations.
    out = jax.block_until_ready(net(x))
    assert out.shape == (batch, dims[-1])
    assert jnp.allclose(out, ref_bf16, atol=2e-3, rtol=2e-3), \
        "bf16 path mismatch vs bf16-operand JAX reference"
    assert jnp.allclose(out, ref_f32, atol=3e-2, rtol=3e-2), \
        "bf16 path mismatch vs f32 JAX reference"

    # Exact f32 MXU path.
    out_f32 = jax.block_until_ready(net(x, use_bf16_matmul=False))
    assert jnp.allclose(out_f32, ref_f32, atol=1e-5, rtol=1e-5), \
        "f32 path mismatch vs JAX reference"

    print("KERNEL_OK")
</pallas_src>

<mosaic_0001>
module attributes {stable_mosaic.version = 11 : i64} {
  func.func @_fcnet_fused_kernel(%arg0: i32, %arg1: memref<128x32xf32, #tpu.memory_space<vmem>>, %arg2: memref<32x128xbf16, #tpu.memory_space<vmem>>, %arg3: memref<1x128xf32, #tpu.memory_space<vmem>>, %arg4: memref<128x128xbf16, #tpu.memory_space<vmem>>, %arg5: memref<1x128xf32, #tpu.memory_space<vmem>>, %arg6: memref<128x128xf32, #tpu.memory_space<vmem>>) attributes {dimension_semantics = [#tpu.dimension_semantics<parallel>], iteration_bounds = array<i64: 2>, scalar_prefetch = 0 : i64, scratch_operands = 0 : i64, tpu.core_type = #tpu.core_type<tc>, window_params = [{transform_indices = @transform_0, window_bounds = array<i64: 128, 32>}, {pipeline_mode = #tpu.pipeline_mode<synchronous>, transform_indices = @transform_1, window_bounds = array<i64: 32, 128>}, {pipeline_mode = #tpu.pipeline_mode<synchronous>, transform_indices = @transform_2, window_bounds = array<i64: 1, 128>}, {pipeline_mode = #tpu.pipeline_mode<synchronous>, transform_indices = @transform_3, window_bounds = array<i64: 128, 128>}, {pipeline_mode = #tpu.pipeline_mode<synchronous>, transform_indices = @transform_4, window_bounds = array<i64: 1, 128>}, {transform_indices = @transform_5, window_bounds = array<i64: 128, 128>}]} {
    %c0 = arith.constant 0 : index
    %c0_0 = arith.constant 0 : index
    %0 = vector.load %arg1[%c0, %c0_0] : memref<128x32xf32, #tpu.memory_space<vmem>>, vector<128x32xf32>
    %c0_1 = arith.constant 0 : index
    %c0_2 = arith.constant 0 : index
    %1 = vector.load %arg2[%c0_1, %c0_2] : memref<32x128xbf16, #tpu.memory_space<vmem>>, vector<32x128xbf16>
    %c0_3 = arith.constant 0 : index
    %c0_4 = arith.constant 0 : index
    %2 = vector.load %arg3[%c0_3, %c0_4] : memref<1x128xf32, #tpu.memory_space<vmem>>, vector<1x128xf32>
    %3 = arith.truncf %0 : vector<128x32xf32> to vector<128x32xbf16>
    %cst = arith.constant dense<0.000000e+00> : vector<128x128xf32>
    %4 = tpu.matmul %3, %1, %cst {dimension_numbers = #tpu.dot_dimension_numbers<[1], [0], [0], [1], [0, 0, 1, 1], [], []>} : vector<128x32xbf16>, vector<32x128xbf16>, vector<128x128xf32> -> vector<128x128xf32>
    %5 = vector.broadcast %2 : vector<1x128xf32> to vector<128x128xf32>
    %6 = arith.addf %4, %5 : vector<128x128xf32>
    %7 = math.tanh %6 : vector<128x128xf32>
    %c0_5 = arith.constant 0 : index
    %c0_6 = arith.constant 0 : index
    %8 = vector.load %arg4[%c0_5, %c0_6] : memref<128x128xbf16, #tpu.memory_space<vmem>>, vector<128x128xbf16>
    %c0_7 = arith.constant 0 : index
    %c0_8 = arith.constant 0 : index
    %9 = vector.load %arg5[%c0_7, %c0_8] : memref<1x128xf32, #tpu.memory_space<vmem>>, vector<1x128xf32>
    %10 = arith.truncf %7 : vector<128x128xf32> to vector<128x128xbf16>
    %cst_9 = arith.constant dense<0.000000e+00> : vector<128x128xf32>
    %11 = tpu.matmul %10, %8, %cst_9 {dimension_numbers = #tpu.dot_dimension_numbers<[1], [0], [0], [1], [0, 0, 1, 1], [], []>} : vector<128x128xbf16>, vector<128x128xbf16>, vector<128x128xf32> -> vector<128x128xf32>
    %12 = vector.broadcast %9 : vector<1x128xf32> to vector<128x128xf32>
    %13 = arith.addf %11, %12 : vector<128x128xf32>
    %cst_10 = arith.constant 5.000000e-01 : f32
    %14 = vector.broadcast %cst_10 : f32 to vector<128x128xf32>
    %15 = arith.mulf %14, %13 : vector<128x128xf32>
    %16 = math.tanh %15 : vector<128x128xf32>
    %cst_11 = arith.constant 1.000000e+00 : f32
    %17 = vector.broadcast %cst_11 : f32 to vector<128x128xf32>
    %18 = arith.addf %17, %16 : vector<128x128xf32>
    %cst_12 = arith.constant 5.000000e-01 : f32
    %19 = vector.broadcast %cst_12 : f32 to vector<128x128xf32>
    %20 = arith.mulf %19, %18 : vector<128x128xf32>
    %c0_13 = arith.constant 0 : index
    %c0_14 = arith.constant 0 : index
    %21 = vector.load %arg6[%c0_13, %c0_14] : memref<128x128xf32, #tpu.memory_space<vmem>>, vector<128x128xf32>
    tpu.vector_store %arg6[%c0_13, %c0_14], %20 {strides = array<i32>} : memref<128x128xf32, #tpu.memory_space<vmem>>, vector<128x128xf32>,
    return
  }
  func.func @transform_0(%arg0: i32) -> (i32, i32) {
    %c0_i32 = arith.constant 0 : i32
    %c0_i32_0 = arith.constant 0 : i32
    return %arg0, %c0_i32 : i32, i32
  }
  func.func @transform_1(%arg0: i32) -> (i32, i32) {
    %c0_i32 = arith.constant 0 : i32
    %c0_i32_0 = arith.constant 0 : i32
    %c0_i32_1 = arith.constant 0 : i32
    return %c0_i32, %c0_i32_0 : i32, i32
  }
  func.func @transform_2(%arg0: i32) -> (i32, i32) {
    %c0_i32 = arith.constant 0 : i32
    %c0_i32_0 = arith.constant 0 : i32
    %c0_i32_1 = arith.constant 0 : i32
    return %c0_i32, %c0_i32_0 : i32, i32
  }
  func.func @transform_3(%arg0: i32) -> (i32, i32) {
    %c0_i32 = arith.constant 0 : i32
    %c0_i32_0 = arith.constant 0 : i32
    %c0_i32_1 = arith.constant 0 : i32
    return %c0_i32, %c0_i32_0 : i32, i32
  }
  func.func @transform_4(%arg0: i32) -> (i32, i32) {
    %c0_i32 = arith.constant 0 : i32
    %c0_i32_0 = arith.constant 0 : i32
    %c0_i32_1 = arith.constant 0 : i32
    return %c0_i32, %c0_i32_0 : i32, i32
  }
  func.func @transform_5(%arg0: i32) -> (i32, i32) {
    %c0_i32 = arith.constant 0 : i32
    %c0_i32_0 = arith.constant 0 : i32
    return %arg0, %c0_i32 : i32, i32
  }
}

</mosaic_0001>

<bundles_post_ra>
// kernel: tpu_custom_call.1
= control target key start
LH: loop header
LB: loop body
LE: loop exit
PB: predicated region body
PF: predicated region fallthrough
CT: control target
= control target key end

     0   :  { %10 = vsyncpa [#allocation3], 0  ;;  %s1133_s0 = inlined_call_operand.vmem [shape: f32[256,32], index: 0, kind: input, shape index: {}]   ;;  %s1134_s1 = inlined_call_operand.vmem [shape: bf16[32,128], index: 1, kind: input, shape index: {}]   ;;  %s1135_s2 = inlined_call_operand.vmem [shape: f32[1,128], index: 2, kind: input, shape index: {}]   ;;  %s1136_s3 = inlined_call_operand.vmem [shape: bf16[128,128], index: 3, kind: input, shape index: {}]   ;;  %s1137_s4 = inlined_call_operand.vmem [shape: f32[1,128], index: 4, kind: input, shape index: {}]   ;;  %s1138_s5 = inlined_call_operand.hbm [shape: f32[256,128], index: 5, kind: output, shape index: {}]  }
   0x1   :  { %12 = vsyncpa [#allocation3 + $0x1], 0  ;;  %s928_s18 = smov 0   ;;  %s930_s19 = smov 0  }
   0x2   :  { %s932_s20 = smov 0   ;;  %s934_s21 = smov 0  }
   0x3 LB: > { %s949_s22 = sadd.s32 4294967295, %s894_s21   ;;  %s644_s23 = sadd.s32 4294967294, %s894_s21   ;;  %s894_s21 = sphi %s934_s21, %s1144_s21   ;;  %s890_s20 = sphi %s932_s20, %s1143_s20   ;;  %s886_s19 = sphi %s930_s19, %s1142_s19   ;;  %s882_s18 = sphi %s928_s18, %s1141_s18  }
   0x4   : > { %s953_s24 = sadd.s32 1, %s894_s21   ;;  %s135_s25 = sadd.s32 1, %s890_s20 }
   0x5   : > { %s132_s26 = ssub.s32 %s894_s21, %s953_s24  ;;  %p145_p0 = scmp.ne.s32.totalorder %s890_s20, %s886_s19 }
   0x6   : > { %p133_p1 = scmp.eq.s32.totalorder %s132_s26, 0  ;;  %p146_p2 = scmp.eq.s32.totalorder %s949_s22, 1 }
   0x7   : > { %p151_p3 = scmp.ne.s32.totalorder %s886_s19, %s882_s18  ;;  %p152_p4 = scmp.eq.s32.totalorder %s644_s23, 1 }
   0x8   : > { %s964_s27 = scalar_select %p133_p1, %s890_s20, %s135_s25  }
   0x9   : > { %p966_p5 = por %p146_p2, %p145_p0  ;;  %p970_p6 = por %p152_p4, %p151_p3 }
   0xa   : > { %p647_p7 = scmp.ge.s32.totalorder %s894_s21, 1  ;;  %p191_p8 = scmp.lt.s32.totalorder %s894_s21, 3 }
   0xc   : > { %p192_p9 = pnand %p647_p7, %p191_p8 }
   0xd   : > { %s649_s7 = sshll.u32 (!%p192_p9), %s949_s22, 4  ;;  %s216_s23 = sand.u32 (!%p192_p9), 1, %s886_s19  }
   0xe   : > { %195 = sbr.rel (%p192_p9) target bundleno = 443 (0x1bb), region = 40  ;;  %p220_p10 = scmp.lt.s32.totalorder (!%p192_p9), %s649_s7, 31 }
   0xf   : > { %s648_s25 = sshll.u32 (!%p192_p9), %s216_s23, 7  ;;  %s714_s30 = sshll.u32 (!%p192_p9), %s949_s22, 7 }
  0x10   : > { %s1067_s26 = scalar_lea.vmem (!%p192_p9), [#allocation2], %s648_s25  ;;  %s578_s8 = scalar_lea.hbm (!%p192_p9), %s1138_s5, %s714_s30 }
  0x11   : > { %s579_s9 = sshll.u32 (!%p192_p9), %s1067_s26, 4  ;;  %s567_s11 = scalar_lea.sflag (!%p192_p9), [#allocation3], %s216_s23  ;;  %s580_s9 = int_to_ptr.vmem [resolvable:$true] %s579_s9 }
  0x12   : > { %s852_s15 = scalar_lea.hbm (!%p192_p9), %s1138_s5, 256 }
  0x13   : > { %v705_v0 = vld [vmem:[%s1134_s1 + $0x8] sm:$0xff]  ;;  %v704_v1 = vld [vmem:[%s1134_s1] sm:$0xff]  ;;  %s1146_s7 = smov (!%p220_p10, %s649_s7), 31  ;;  %vm271_vm0 = vcmask 261120   ;;  %v713_v14 = vld [vmem:[%s1136_s3 + $0x38] sm:$0xff] }
  0x14   : > { %302 = vmatpush.bf16.msra.mxu0 %v705_v0  ;;  %715 = vmatpush.bf16.msra.mxu3 %v705_v0  ;;  %s650_s10 = sshll.u32 %s1146_s7, 3  ;;  %v712_v15 = vld [vmem:[%s1136_s3 + $0x30] sm:$0xff]  ;;  %v711_v16 = vld [vmem:[%s1136_s3 + $0x28] sm:$0xff]  ;;  %v710_v29 = vld [vmem:[%s1136_s3 + $0x20] sm:$0xff] }
  0x15   : > { %s986_s13 = scalar_lea.vmem %s1133_s0, %s650_s10  ;;  %437 = vmatpush.bf16.msra.mxu1 %v713_v14  ;;  %717 = vmatpush.bf16.msra.mxu2 %v713_v14  ;;  %v709_v30 = vld [vmem:[%s1136_s3 + $0x18] sm:$0xff]  ;;  %v708_v31 = vld [vmem:[%s1136_s3 + $0x10] sm:$0xff]  ;;  %v707_v32 = vld [vmem:[%s1136_s3 + $0x8] sm:$0xff]  ;;  %s581_s10 = sshll.u32 %s578_s8, 4  ;;  %s582_s10 = int_to_ptr.hbm [resolvable:$true] %s581_s10 }
  0x16   : > { %v227_v2 = vld [vmem:[%s986_s13] sm:$0xff]  ;;  %v228_v3 = vld [vmem:[%s986_s13 + $0x8] sm:$0xff]  ;;  %v229_v5 = vld [vmem:[%s986_s13 + $0x10] sm:$0xff]  ;;  %s846_s12 = sshra.s32 %s582_s10, 4  ;;  %s847_s12 = int_to_ptr.hbm [resolvable:$true] %s846_s12 }
  0x17   : > { %v248_v4 = vpack.c.bf16 %v228_v3, %v227_v2  ;;  %v230_v6 = vld [vmem:[%s986_s13 + $0x18] sm:$0xff]  ;;  %v231_v8 = vld [vmem:[%s986_s13 + $0x20] sm:$0xff]  ;;  %v232_v9 = vld [vmem:[%s986_s13 + $0x28] sm:$0xff]  ;;  %s848_s22 = scalar_lea.hbm %s847_s12, 128  ;;  %p853_p0 = scmp.lt.s32.totalorder %s847_s12, %s1138_s5 }
  0x18   : > { %303 = vmatpush.bf16.msra.mxu0 %v704_v1  ;;  %716 = vmatpush.bf16.msra.mxu3 %v704_v1  ;;  %v249_v7 = vpack.c.bf16 %v230_v6, %v229_v5  ;;  %v250_v10 = vpack.c.bf16 %v232_v9, %v231_v8  ;;  %v237_v11 = vld [vmem:[%s986_s13 + $0x50] sm:$0xff]  ;;  %v238_v12 = vld [vmem:[%s986_s13 + $0x58] sm:$0xff]  ;;  %v239_v19 = vld [vmem:[%s986_s13 + $0x60] sm:$0xff]  ;;  %p849_p11 = scmp.ne.s32.totalorder %s847_s12, %s848_s22  ;;  %p854_p1 = scmp.lt.s32.totalorder %s852_s15, %s848_s22 }
  0x19   : > { %v253_v13 = vpack.c.bf16 %v238_v12, %v237_v11  ;;  %438 = vmatpush.bf16.msra.mxu1 %v712_v15  ;;  %718 = vmatpush.bf16.msra.mxu2 %v712_v15  ;;  %v233_v17 = vld [vmem:[%s986_s13 + $0x30] sm:$0xff]  ;;  %v234_v18 = vld [vmem:[%s986_s13 + $0x38] sm:$0xff]  ;;  %v240_v20 = vld [vmem:[%s986_s13 + $0x68] sm:$0xff] }
  0x1a   : > { %v251_v21 = vpack.c.bf16 %v234_v18, %v233_v17  ;;  %v254_v22 = vpack.c.bf16 %v240_v20, %v239_v19  ;;  %v235_v23 = vld [vmem:[%s986_s13 + $0x40] sm:$0xff]  ;;  %v236_v24 = vld [vmem:[%s986_s13 + $0x48] sm:$0xff]  ;;  %v241_v25 = vld [vmem:[%s986_s13 + $0x70] sm:$0xff]  ;;  %p850_p12 = pnand %p849_p11, %p966_p5  ;;  %p855_p2 = por %p854_p1, %p853_p0 }
  0x1b   : > { %659 = vmatmul.msk.bf16.vlgmr.msra.gmra.mxu0 %vm271_vm0, %v248_v4  ;;  %664 = vmatmul.msk.bf16.vlgmr.msra.gmra.mxu3 %vm271_vm0, %v253_v13  ;;  %v242_v26 = vld [vmem:[%s986_s13 + $0x78] sm:$0xff]  ;;  %v252_v27 = vpack.c.bf16 %v236_v24, %v235_v23  ;;  %v706_v33 = vld [vmem:[%s1136_s3] sm:$0xff] }
  0x1c   : > { %v255_v28 = vpack.c.bf16 %v242_v26, %v241_v25  ;;  %v1039_v35 = vld [vmem:[%s1135_s2] ss:$0 sm:$0xff]  ;;  %p851_p13 = pneg %p850_p12 }
  0x1d   : > { %439 = vmatpush.bf16.msra.mxu1 %v711_v16  ;;  %719 = vmatpush.bf16.msra.mxu2 %v711_v16 }
  0x1e   : > { %p856_p3 = pnand %p855_p2, %p851_p13 }
  0x21   : > { %440 = vmatpush.bf16.msra.mxu1 %v710_v29  ;;  %720 = vmatpush.bf16.msra.mxu2 %v710_v29 }
  0x25   : > { %441 = vmatpush.bf16.msra.mxu1 %v709_v30  ;;  %721 = vmatpush.bf16.msra.mxu2 %v709_v30 }
  0x29   : > { %442 = vmatpush.bf16.msra.mxu1 %v708_v31  ;;  %722 = vmatpush.bf16.msra.mxu2 %v708_v31 }
  0x2b   : > { %660 = vmatmul.msk.bf16.gmra.mxu0 %vm271_vm0, %v249_v7  ;;  %665 = vmatmul.msk.bf16.gmra.mxu3 %vm271_vm0, %v254_v22 }
  0x2d   : > { %443 = vmatpush.bf16.msra.mxu1 %v707_v32  ;;  %723 = vmatpush.bf16.msra.mxu2 %v707_v32 }
  0x31   : > { %444 = vmatpush.bf16.msra.mxu1 %v706_v33  ;;  %724 = vmatpush.bf16.msra.mxu2 %v706_v33 }
  0x3b   : > { %661 = vmatmul.msk.bf16.gmra.mxu0 %vm271_vm0, %v250_v10  ;;  %666 = vmatmul.msk.bf16.gmra.mxu3 %vm271_vm0, %v255_v28 }
  0x4b   : > { %662 = vmatmul.msk.bf16.gmra.mxu0 %vm271_vm0, %v251_v21 }
  0x5b   : > { %663 = vmatmul.msk.bf16.gmra.mxu0 %vm271_vm0, %v252_v27  ;;  %v1060_v27 = vld [vmem:[%s1137_s4] ss:$0 sm:$0xff] }
  0x98   : > { %v305_v34 = vpop.f32.mrf.mxu0 }
  0x99   : > { %v306_v36 = vadd.f32 %v1039_v35, %v305_v34 }
  0x9b   : > { %768 = vtanh.f32 %v306_v36 }
  0x9e   : > { %v330_v62 = vpop.f32.mrf.mxu3 }
  0x9f   : > { %v331_v8 = vadd.f32 %v1039_v35, %v330_v62 }
  0xa0   : > { %v307_v37 = vpop.f32.mrf.mxu0 }
  0xa1   : > { %v308_v38 = vadd.f32 %v1039_v35, %v307_v37  ;;  %v769_v39 = vpop.eup %768 }
  0xa3   : > { %770 = vtanh.f32 %v308_v38 }
  0xa6   : > { %v332_v4 = vpop.f32.mrf.mxu3 }
  0xa7   : > { %v333_v10 = vadd.f32 %v1039_v35, %v332_v4 }
  0xa8   : > { %v310_v40 = vpop.f32.mrf.mxu0 }
  0xa9   : > { %v771_v41 = vpop.eup %770  ;;  %v311_v43 = vadd.f32 %v1039_v35, %v310_v40 }
  0xaa   : > { %v378_v42 = vpack.c.bf16 %v771_v41, %v769_v39 }
  0xab   : > { %772 = vtanh.f32 %v311_v43 }
  0xac   : > { %445 = vmatmul.bf16.vlgmr.msra.gmra.mxu1 %v378_v42 }
  0xae   : > { %v335_v9 = vpop.f32.mrf.mxu3 }
  0xaf   : > { %v336_v15 = vadd.f32 %v1039_v35, %v335_v9 }
  0xb0   : > { %v312_v44 = vpop.f32.mrf.mxu0 }
  0xb1   : > { %v313_v45 = vadd.f32 %v1039_v35, %v312_v44  ;;  %v773_v46 = vpop.eup %772 }
  0xb3   : > { %774 = vtanh.f32 %v313_v45 }
  0xb6   : > { %v337_v12 = vpop.f32.mrf.mxu3 }
  0xb7   : > { %v338_v16 = vadd.f32 %v1039_v35, %v337_v12 }
  0xb8   : > { %v315_v47 = vpop.f32.mrf.mxu0 }
  0xb9   : > { %v775_v48 = vpop.eup %774  ;;  %v316_v50 = vadd.f32 %v1039_v35, %v315_v47 }
  0xba   : > { %v379_v49 = vpack.c.bf16 %v775_v48, %v773_v46 }
  0xbb   : > { %776 = vtanh.f32 %v316_v50 }
  0xbc   : > { %450 = vmatmul.bf16.gmra.mxu1 %v379_v49 }
  0xbe   : > { %v340_v17 = vpop.f32.mrf.mxu3 }
  0xbf   : > { %v341_v22 = vadd.f32 %v1039_v35, %v340_v17 }
  0xc0   : > { %v317_v51 = vpop.f32.mrf.mxu0 }
  0xc1   : > { %v318_v52 = vadd.f32 %v1039_v35, %v317_v51  ;;  %v777_v53 = vpop.eup %776 }
  0xc3   : > { %778 = vtanh.f32 %v318_v52 }
  0xc6   : > { %v342_v20 = vpop.f32.mrf.mxu3 }
  0xc7   : > { %v343_v23 = vadd.f32 %v1039_v35, %v342_v20 }
  0xc8   : > { %v320_v54 = vpop.f32.mrf.mxu0 }
  0xc9   : > { %v779_v55 = vpop.eup %778  ;;  %v321_v57 = vadd.f32 %v1039_v35, %v320_v54 }
  0xca   : > { %v380_v56 = vpack.c.bf16 %v779_v55, %v777_v53 }
  0xcb   : > { %780 = vtanh.f32 %v321_v57 }
  0xcc   : > { %455 = vmatmul.bf16.gmra.mxu1 %v380_v56 }
  0xd0   : > { %v322_v58 = vpop.f32.mrf.mxu0 }
  0xd1   : > { %v323_v59 = vadd.f32 %v1039_v35, %v322_v58  ;;  %v781_v60 = vpop.eup %780 }
  0xd3   : > { %782 = vtanh.f32 %v323_v59 }
  0xd8   : > { %v325_v61 = vpop.f32.mrf.mxu0 }
  0xd9   : > { %v783_v63 = vpop.eup %782  ;;  %v326_v1 = vadd.f32 %v1039_v35, %v325_v61 }
  0xda   : > { %v381_v0 = vpack.c.bf16 %v783_v63, %v781_v60 }
  0xdb   : > { %784 = vtanh.f32 %v326_v1 }
  0xdc   : > { %460 = vmatmul.bf16.gmra.mxu1 %v381_v0 }
  0xe0   : > { %v327_v2 = vpop.f32.mrf.mxu0 }
  0xe1   : > { %v328_v3 = vadd.f32 %v1039_v35, %v327_v2  ;;  %v785_v5 = vpop.eup %784 }
  0xe3   : > { %786 = vtanh.f32 %v328_v3 }
  0xe4   : > { %788 = vtanh.f32 %v331_v8 }
  0xe5   : > { %790 = vtanh.f32 %v333_v10 }
  0xe6   : > { %792 = vtanh.f32 %v336_v15 }
  0xe7   : > { %794 = vtanh.f32 %v338_v16 }
  0xe8   : > { %796 = vtanh.f32 %v341_v22 }
  0xe9   : > { %v787_v6 = vpop.eup %786  ;;  %798 = vtanh.f32 %v343_v23 }
  0xea   : > { %v382_v7 = vpack.c.bf16 %v787_v6, %v785_v5  ;;  %v789_v11 = vpop.eup %788 }
  0xeb   : > { %v791_v13 = vpop.eup %790 }
  0xec   : > { %465 = vmatmul.bf16.vlgmr.msra.gmra.mxu2 %v382_v7  ;;  %v383_v14 = vpack.c.bf16 %v791_v13, %v789_v11  ;;  %v793_v18 = vpop.eup %792 }
  0xed   : > { %v795_v19 = vpop.eup %794 }
  0xee   : > { %v384_v21 = vpack.c.bf16 %v795_v19, %v793_v18  ;;  %v797_v24 = vpop.eup %796 }
  0xef   : > { %v799_v25 = vpop.eup %798 }
  0xf0   : > { %v385_v26 = vpack.c.bf16 %v799_v25, %v797_v24 }
  0xfc   : > { %470 = vmatmul.bf16.gmra.mxu2 %v383_v14 }
 0x10c   : > { %475 = vmatmul.bf16.gmra.mxu2 %v384_v21 }
 0x11c   : > { %480 = vmatmul.bf16.gmra.mxu2 %v385_v26 }
 0x129   : > { %v446_v28 = vpop.f32.mrf.mxu1 }
 0x12a   : > { %v447_v29 = vadd.f32 %v1060_v27, %v446_v28 }
 0x12c   : > { %v486_v30 = vmul.f32 0.5, %v447_v29 }
 0x12e   : > { %800 = vtanh.f32 %v486_v30 }
 0x131   : > { %v448_v31 = vpop.f32.mrf.mxu1 }
 0x132   : > { %v449_v32 = vadd.f32 %v1060_v27, %v448_v31 }
 0x134   : > { %v801_v33 = vpop.eup %800  ;;  %v487_v34 = vmul.f32 0.5, %v449_v32 }
 0x135   : > { %v518_v35 = vadd.f32 1.0, %v801_v33 }
 0x136   : > { %802 = vtanh.f32 %v487_v34 }
 0x137   : > { %v534_v36 = vmul.f32 0.5, %v518_v35 }
 0x139   : > { %550 = vst [vmem:[%s1067_s26] sm:$0xff] %v534_v36  ;;  %v451_v37 = vpop.f32.mrf.mxu1 }
 0x13a   : > { %v452_v38 = vadd.f32 %v1060_v27, %v451_v37 }
 0x13c   : > { %v803_v39 = vpop.eup %802  ;;  %v488_v40 = vmul.f32 0.5, %v452_v38 }
 0x13d   : > { %v519_v41 = vadd.f32 1.0, %v803_v39 }
 0x13e   : > { %804 = vtanh.f32 %v488_v40 }
 0x13f   : > { %v535_v42 = vmul.f32 0.5, %v519_v41 }
 0x141   : > { %551 = vst [vmem:[%s1067_s26 + $0x8] sm:$0xff] %v535_v42  ;;  %v453_v43 = vpop.f32.mrf.mxu1 }
 0x142   : > { %v454_v44 = vadd.f32 %v1060_v27, %v453_v43 }
 0x144   : > { %v805_v45 = vpop.eup %804  ;;  %v489_v46 = vmul.f32 0.5, %v454_v44 }
 0x145   : > { %v520_v47 = vadd.f32 1.0, %v805_v45 }
 0x146   : > { %806 = vtanh.f32 %v489_v46 }
 0x147   : > { %v536_v48 = vmul.f32 0.5, %v520_v47 }
 0x149   : > { %552 = vst [vmem:[%s1067_s26 + $0x10] sm:$0xff] %v536_v48  ;;  %v456_v49 = vpop.f32.mrf.mxu1 }
 0x14a   : > { %v457_v50 = vadd.f32 %v1060_v27, %v456_v49 }
 0x14c   : > { %v807_v51 = vpop.eup %806  ;;  %v490_v52 = vmul.f32 0.5, %v457_v50 }
 0x14d   : > { %v521_v53 = vadd.f32 1.0, %v807_v51 }
 0x14e   : > { %808 = vtanh.f32 %v490_v52 }
 0x14f   : > { %v537_v54 = vmul.f32 0.5, %v521_v53 }
 0x151   : > { %553 = vst [vmem:[%s1067_s26 + $0x18] sm:$0xff] %v537_v54  ;;  %v458_v55 = vpop.f32.mrf.mxu1 }
 0x152   : > { %v459_v56 = vadd.f32 %v1060_v27, %v458_v55 }
 0x154   : > { %v809_v57 = vpop.eup %808  ;;  %v491_v58 = vmul.f32 0.5, %v459_v56 }
 0x155   : > { %v522_v59 = vadd.f32 1.0, %v809_v57 }
 0x156   : > { %810 = vtanh.f32 %v491_v58 }
 0x157   : > { %v538_v60 = vmul.f32 0.5, %v522_v59 }
 0x159   : > { %554 = vst [vmem:[%s1067_s26 + $0x20] sm:$0xff] %v538_v60  ;;  %v461_v61 = vpop.f32.mrf.mxu1 }
 0x15a   : > { %v462_v62 = vadd.f32 %v1060_v27, %v461_v61 }
 0x15c   : > { %v811_v63 = vpop.eup %810  ;;  %v492_v0 = vmul.f32 0.5, %v462_v62 }
 0x15d   : > { %v523_v1 = vadd.f32 1.0, %v811_v63 }
 0x15e   : > { %812 = vtanh.f32 %v492_v0 }
 0x15f   : > { %v539_v2 = vmul.f32 0.5, %v523_v1 }
 0x161   : > { %555 = vst [vmem:[%s1067_s26 + $0x28] sm:$0xff] %v539_v2  ;;  %v463_v3 = vpop.f32.mrf.mxu1 }
 0x162   : > { %v464_v4 = vadd.f32 %v1060_v27, %v463_v3 }
 0x164   : > { %v813_v5 = vpop.eup %812  ;;  %v493_v6 = vmul.f32 0.5, %v464_v4 }
 0x165   : > { %v524_v7 = vadd.f32 1.0, %v813_v5 }
 0x166   : > { %814 = vtanh.f32 %v493_v6 }
 0x167   : > { %v540_v8 = vmul.f32 0.5, %v524_v7 }
 0x169   : > { %556 = vst [vmem:[%s1067_s26 + $0x30] sm:$0xff] %v540_v8 }
 0x16c   : > { %v815_v9 = vpop.eup %814 }
 0x16d   : > { %v525_v10 = vadd.f32 1.0, %v815_v9 }
 0x16f   : > { %v541_v11 = vmul.f32 0.5, %v525_v10  ;;  %v466_v12 = vpop.f32.mrf.mxu2 }
 0x170   : > { %v467_v13 = vadd.f32 %v1060_v27, %v466_v12 }
 0x171   : > { %557 = vst [vmem:[%s1067_s26 + $0x38] sm:$0xff] %v541_v11 }
 0x172   : > { %v494_v14 = vmul.f32 0.5, %v467_v13 }
 0x174   : > { %816 = vtanh.f32 %v494_v14 }
 0x177   : > { %v468_v15 = vpop.f32.mrf.mxu2 }
 0x178   : > { %v469_v16 = vadd.f32 %v1060_v27, %v468_v15 }
 0x17a   : > { %v817_v17 = vpop.eup %816  ;;  %v495_v18 = vmul.f32 0.5, %v469_v16 }
 0x17b   : > { %v526_v19 = vadd.f32 1.0, %v817_v17 }
 0x17c   : > { %818 = vtanh.f32 %v495_v18 }
 0x17d   : > { %v542_v20 = vmul.f32 0.5, %v526_v19 }
 0x17f   : > { %558 = vst [vmem:[%s1067_s26 + $0x40] sm:$0xff] %v542_v20  ;;  %v471_v21 = vpop.f32.mrf.mxu2 }
 0x180   : > { %v472_v22 = vadd.f32 %v1060_v27, %v471_v21 }
 0x182   : > { %v819_v23 = vpop.eup %818  ;;  %v496_v24 = vmul.f32 0.5, %v472_v22 }
 0x183   : > { %v527_v25 = vadd.f32 1.0, %v819_v23 }
 0x184   : > { %820 = vtanh.f32 %v496_v24 }
 0x185   : > { %v543_v26 = vmul.f32 0.5, %v527_v25 }
 0x187   : > { %559 = vst [vmem:[%s1067_s26 + $0x48] sm:$0xff] %v543_v26  ;;  %v473_v28 = vpop.f32.mrf.mxu2 }
 0x188   : > { %v474_v29 = vadd.f32 %v1060_v27, %v473_v28 }
 0x18a   : > { %v821_v30 = vpop.eup %820  ;;  %v497_v31 = vmul.f32 0.5, %v474_v29 }
 0x18b   : > { %v528_v32 = vadd.f32 1.0, %v821_v30 }
 0x18c   : > { %822 = vtanh.f32 %v497_v31 }
 0x18d   : > { %v544_v33 = vmul.f32 0.5, %v528_v32 }
 0x18f   : > { %560 = vst [vmem:[%s1067_s26 + $0x50] sm:$0xff] %v544_v33  ;;  %v476_v34 = vpop.f32.mrf.mxu2 }
 0x190   : > { %v477_v35 = vadd.f32 %v1060_v27, %v476_v34 }
 0x192   : > { %v823_v36 = vpop.eup %822  ;;  %v498_v37 = vmul.f32 0.5, %v477_v35 }
 0x193   : > { %v529_v38 = vadd.f32 1.0, %v823_v36 }
 0x194   : > { %824 = vtanh.f32 %v498_v37 }
 0x195   : > { %v545_v39 = vmul.f32 0.5, %v529_v38 }
 0x197   : > { %561 = vst [vmem:[%s1067_s26 + $0x58] sm:$0xff] %v545_v39  ;;  %v478_v40 = vpop.f32.mrf.mxu2 }
 0x198   : > { %v479_v41 = vadd.f32 %v1060_v27, %v478_v40 }
 0x19a   : > { %v825_v42 = vpop.eup %824  ;;  %v499_v43 = vmul.f32 0.5, %v479_v41 }
 0x19b   : > { %v530_v44 = vadd.f32 1.0, %v825_v42 }
 0x19c   : > { %826 = vtanh.f32 %v499_v43 }
 0x19d   : > { %v546_v45 = vmul.f32 0.5, %v530_v44 }
 0x19f   : > { %562 = vst [vmem:[%s1067_s26 + $0x60] sm:$0xff] %v546_v45  ;;  %v481_v46 = vpop.f32.mrf.mxu2 }
 0x1a0   : > { %v482_v47 = vadd.f32 %v1060_v27, %v481_v46 }
 0x1a2   : > { %v827_v48 = vpop.eup %826  ;;  %v500_v49 = vmul.f32 0.5, %v482_v47 }
 0x1a3   : > { %v531_v50 = vadd.f32 1.0, %v827_v48 }
 0x1a4   : > { %828 = vtanh.f32 %v500_v49 }
 0x1a5   : > { %v547_v51 = vmul.f32 0.5, %v531_v50 }
 0x1a7   : > { %563 = vst [vmem:[%s1067_s26 + $0x68] sm:$0xff] %v547_v51  ;;  %v483_v52 = vpop.f32.mrf.mxu2 }
 0x1a8   : > { %v484_v53 = vadd.f32 %v1060_v27, %v483_v52 }
 0x1aa   : > { %v829_v54 = vpop.eup %828  ;;  %v501_v55 = vmul.f32 0.5, %v484_v53 }
 0x1ab   : > { %v532_v56 = vadd.f32 1.0, %v829_v54 }
 0x1ac   : > { %830 = vtanh.f32 %v501_v55 }
 0x1ad   : > { %v548_v57 = vmul.f32 0.5, %v532_v56 }
 0x1af   : > { %564 = vst [vmem:[%s1067_s26 + $0x70] sm:$0xff] %v548_v57 }
 0x1b2   : > { %v831_v58 = vpop.eup %830 }
 0x1b3   : > { %v533_v59 = vadd.f32 1.0, %v831_v58 }
 0x1b5   : > { %v549_v27 = vmul.f32 0.5, %v533_v59 }
 0x1b7   : > { %565 = vst [vmem:[%s1067_s26 + $0x78] sm:$0xff] %v549_v27 }
 0x1b8   : > { %859 = shalt.err (!%p856_p3)
}
 0x1b9   : > { %s896_s23 = smov 128   ;;  %s897_s25 = smov 8  }
 0x1ba   : > { %725 = dma.vmem_to_hbm [thread:$0]  (%p966_p5), %s580_s9, 2048, %s582_s10, %s567_s11, %s896_s23, %s896_s23, %s897_s25  }
 0x1bb PF: > { %p731_p4 = scmp.ge.s32.totalorder %s894_s21, 2  ;;  %s596_s26 = sand.u32 1, %s882_s18  }
 0x1bc   : > { %s597_s30 = scalar_lea.sflag [#allocation3], %s596_s26 }
 0x1bd   : > { %p728_p7 = pnand %p731_p4, %p970_p6 }
 0x1bf   : > { %p729_p8 = pneg %p728_p7 }
 0x1c1   : > { %877 = dma.done.wait (%p729_p8), %s597_s30, 2048  }
 0x1c2   : > { %879 = vsyncadd (%p729_p8), %s597_s30, 4294965248  ;;  %p15_p9 = scmp.ge.s32.totalorder %s953_s24, 4   ;;  %s1141_s18 = smov %s886_s19 }
 0x1c3   : > { %s1142_s19 = smov %s890_s20  ;;  %s1143_s20 = smov %s964_s27 }
 0x1c4   : > { %s1144_s21 = smov %s953_s24  ;;  %17 = sbr.rel (!%p15_p9) target bundleno = 3 (0x3), region = 75 }
 0x1c9   :  { %603 = vsyncpa [#allocation3], 1 }
 0x1ca   :  { %605 = vsyncpa [#allocation3 + $0x1], 1 }

</bundles_post_ra>
